<compile_context>
chip_gen: v6e
topology: v6e:2x2x1
jax: 0.10.0
libtpu: 0.0.40
codegen_flags: <defaults>
</compile_context>

<pallas_src>
import jax
import jax.numpy as jnp
from jax.experimental import pallas as pl
from jax.experimental.pallas import tpu as pltpu

HIDDEN = 240   # logical hidden width of the original Net (only used at prep time)
LANE = 128     # TPU lane width; output is padded to a multiple of this


def folded_affine_kernel(x_ref, w_ref, b_ref, o_ref):
    # Single grid point, everything resident in VMEM.
    # x: (batch, in_features)  w: (in_features, n_pad)  b: (1, n_pad)
    # One MXU pass + one VPU broadcast-add; lane-dense (n_pad = k*128) store.
    o_ref[...] = (
        jnp.dot(x_ref[...], w_ref[...], preferred_element_type=jnp.float32)
        + b_ref[...]
    )


def init_linear_params(key, fan_in, fan_out):
    """Deterministic init mimicking torch.nn.Linear (Kaiming-uniform-ish)."""
    kw, kb = jax.random.split(key)
    bound = 1.0 / jnp.sqrt(fan_in)
    # stored as (in, out) so forward is x @ W + b
    w = jax.random.uniform(kw, (fan_in, fan_out), jnp.float32, -bound, bound)
    b = jax.random.uniform(kb, (1, fan_out), jnp.float32, -bound, bound)
    return w, b


def make_net_params(key, in_features, out_features):
    dims = [in_features, HIDDEN, HIDDEN, HIDDEN, HIDDEN, HIDDEN, out_features]
    keys = jax.random.split(key, 6)
    params = []
    for i in range(6):
        w, b = init_linear_params(keys[i], dims[i], dims[i + 1])
        params.extend([w, b])
    return params  # flat list [w1, b1, ..., w6, b6]


def fold_params(params, out_features):
    """Fold the 6 affine layers into a single (W_total, b_total), lane-padded.

    x@W1+b1 -> ... -> @W6+b6  ==  x @ (W1@W2@...@W6) + ((b1@W2+b2)@W3 ... + b6)
    Exact (up to f32 rounding) because the Net has no nonlinearity.
    """
    w_total = params[0]
    b_total = params[1]
    for i in range(1, 6):
        w, b = params[2 * i], params[2 * i + 1]
        w_total = w_total @ w
        b_total = b_total @ w + b
    # Zero-pad the output dimension to a multiple of 128 so the kernel's
    # store is lane-dense (unmasked vst); zeros keep results exact.
    n_pad = ((out_features + LANE - 1) // LANE) * LANE
    pad = n_pad - out_features
    w_total = jnp.pad(w_total, ((0, 0), (0, pad)))
    b_total = jnp.pad(b_total, ((0, 0), (0, pad)))
    return w_total, b_total


def net_forward(x, w_total, b_total, out_features):
    batch, in_features = x.shape
    n_pad = w_total.shape[1]

    vmem = pl.BlockSpec(memory_space=pltpu.MemorySpace.VMEM)
    itemsize = 4  # f32
    cost = pl.CostEstimate(
        flops=2 * batch * in_features * n_pad,
        transcendentals=0,
        bytes_accessed=(x.size + w_total.size + b_total.size + batch * n_pad)
        * itemsize,
    )

    out_padded = pl.pallas_call(
        folded_affine_kernel,
        out_shape=jax.ShapeDtypeStruct((batch, n_pad), jnp.float32),
        in_specs=[vmem, vmem, vmem],
        out_specs=vmem,
        cost_estimate=cost,
    )(x, w_total, b_total)
    # Slice the lane-padded slab back to the logical output width.
    return out_padded[:, :out_features]


def net_forward_ref(x, params):
    """Pure-JAX reference: the original 6-layer chained forward."""
    y = x
    for i in range(6):
        w, b = params[2 * i], params[2 * i + 1]
        y = y @ w + b
    return y


if __name__ == "__main__":
    key = jax.random.PRNGKey(0)
    k_params, k_x = jax.random.split(key)

    # Small shapes consistent with the module; per-sample cost keeps dropping
    # up to batch~128-256 since this kernel is fixed-cost dominated.
    batch = 8
    in_features = 32
    out_features = 16

    params = make_net_params(k_params, in_features, out_features)
    x = jax.random.normal(k_x, (batch, in_features), jnp.float32)

    # One-time parameter prep (plain JAX, outside the kernel).
    w_total, b_total = fold_params(params, out_features)

    out = net_forward(x, w_total, b_total, out_features)
    out = jax.block_until_ready(out)

    ref = net_forward_ref(x, params)
    assert out.shape == (batch, out_features)
    assert jnp.allclose(out, ref, atol=1e-4, rtol=1e-4), "mismatch vs reference"

    print("KERNEL_OK")
</pallas_src>

<mosaic_0001>
module attributes {stable_mosaic.version = 11 : i64} {
  func.func @folded_affine_kernel(%arg0: memref<8x32xf32, #tpu.memory_space<vmem>>, %arg1: memref<32x128xf32, #tpu.memory_space<vmem>>, %arg2: memref<1x128xf32, #tpu.memory_space<vmem>>, %arg3: memref<8x128xf32, #tpu.memory_space<vmem>>) attributes {dimension_semantics = [], scalar_prefetch = 0 : i64, scratch_operands = 0 : i64, tpu.core_type = #tpu.core_type<tc>} {
    %c0 = arith.constant 0 : index
    %c0_0 = arith.constant 0 : index
    %0 = vector.load %arg0[%c0, %c0_0] : memref<8x32xf32, #tpu.memory_space<vmem>>, vector<8x32xf32>
    %c0_1 = arith.constant 0 : index
    %c0_2 = arith.constant 0 : index
    %1 = vector.load %arg1[%c0_1, %c0_2] : memref<32x128xf32, #tpu.memory_space<vmem>>, vector<32x128xf32>
    %cst = arith.constant dense<0.000000e+00> : vector<8x128xf32>
    %2 = tpu.matmul %0, %1, %cst {dimension_numbers = #tpu.dot_dimension_numbers<[1], [0], [0], [1], [0, 0, 1, 1], [], []>} : vector<8x32xf32>, vector<32x128xf32>, vector<8x128xf32> -> vector<8x128xf32>
    %c0_3 = arith.constant 0 : index
    %c0_4 = arith.constant 0 : index
    %3 = vector.load %arg2[%c0_3, %c0_4] : memref<1x128xf32, #tpu.memory_space<vmem>>, vector<1x128xf32>
    %4 = vector.broadcast %3 : vector<1x128xf32> to vector<8x128xf32>
    %5 = arith.addf %2, %4 : vector<8x128xf32>
    %c0_5 = arith.constant 0 : index
    %c0_6 = arith.constant 0 : index
    %6 = vector.load %arg3[%c0_5, %c0_6] : memref<8x128xf32, #tpu.memory_space<vmem>>, vector<8x128xf32>
    tpu.vector_store %arg3[%c0_5, %c0_6], %5 {strides = array<i32>} : memref<8x128xf32, #tpu.memory_space<vmem>>, vector<8x128xf32>,
    return
  }
}

</mosaic_0001>

<bundles_post_ra>
// kernel: tpu_custom_call.1
= control target key start
LH: loop header
LB: loop body
LE: loop exit
PB: predicated region body
PF: predicated region fallthrough
CT: control target
= control target key end

     0   :  { %8 = vsyncpa [#allocation3], 0  ;;  %s274_s0 = inlined_call_operand.hbm [shape: f32[8,32], index: 0, kind: input, shape index: {}]   ;;  %s275_s1 = inlined_call_operand.hbm [shape: f32[32,128], index: 1, kind: input, shape index: {}]   ;;  %s276_s2 = inlined_call_operand.vmem [shape: f32[1,128], index: 2, kind: input, shape index: {}]   ;;  %s277_s3 = inlined_call_operand.hbm [shape: f32[8,128], index: 3, kind: output, shape index: {}]  }
   0x1   :  { %9 = vsyncpa [#allocation6], 0 }
   0x2   :  { %10 = vsyncpa [#allocation4], 0  ;;  %s235_s12 = smov [#allocation2]   ;;  %s236_s14 = smov [#allocation5]  }
   0x3   :  { %s17_s13 = sshll.u32 %s235_s12, 4  ;;  %s26_s15 = sshll.u32 %s236_s14, 4  ;;  %s18_s13 = int_to_ptr.vmem [resolvable:$true] %s17_s13  ;;  %s27_s15 = int_to_ptr.vmem [resolvable:$true] %s26_s15 }
   0x4   :  { %s177_s16 = scalar_lea.vmem %s18_s13, 128  ;;  %p182_p1 = scmp.lt.s32.totalorder %s18_s13, %s18_s13 }
   0x5   :  { %p178_p0 = scmp.ne.s32.totalorder %s18_s13, %s177_s16  ;;  %p183_p2 = scmp.lt.s32.totalorder %s177_s16, %s177_s16 }
   0x7   :  { %p184_p3 = por %p183_p2, %p182_p1 }
   0x9   :  { %p185_p4 = pnand %p184_p3, %p178_p0 }
   0xb   :  { %188 = shalt.err (!%p185_p4)
}
   0xc   :  { %20 = dma.hbm_to_vmem [thread:$0]  %s274_s0, 128, %s18_s13, [#allocation3]  }
   0xd   :  { %s197_s19 = scalar_lea.vmem %s27_s15, 512  ;;  %p202_p6 = scmp.lt.s32.totalorder %s27_s15, %s27_s15 }
   0xe   :  { %p198_p5 = scmp.ne.s32.totalorder %s27_s15, %s197_s19  ;;  %p203_p7 = scmp.lt.s32.totalorder %s197_s19, %s197_s19 }
  0x10   :  { %p204_p8 = por %p203_p7, %p202_p6 }
  0x12   :  { %p205_p9 = pnand %p204_p8, %p198_p5 }
  0x14   :  { %208 = shalt.err (!%p205_p9)
}
  0x15   :  { %s237_s20 = smov 128   ;;  %s238_s21 = smov 8  }
  0x16   :  { %32 = dma.hbm_to_vmem [thread:$0]  %s275_s1, 512, %s27_s15, [#allocation6], %s237_s20, %s237_s20, %s238_s21  }
  0x17   :  { %229 = dma.done.wait [#allocation3], 128  }
  0x18   :  { %230 = vsyncadd [#allocation3], 4294967168 }
  0x19   :  { %231 = dma.done.wait [#allocation6], 512  }
  0x1a   :  { %232 = vsyncadd [#allocation6], 4294966784  ;;  %v239_v0 = vmov 0.0   ;;  %vm240_vm0 = vmmov 0   ;;  %v45_v1 = vld [vmem:[#allocation5 + $0x18] sm:$0xff]  ;;  %v44_v2 = vld [vmem:[#allocation5 + $0x10] sm:$0xff] }
  0x1b   :  { %151 = vmatprep.subr.mxu0 %v239_v0  ;;  %159 = vmatprep.mubr.msk.f32.mxu0 %vm240_vm0, %v239_v0  ;;  %v43_v3 = vld [vmem:[#allocation5 + $0x8] sm:$0xff]  ;;  %v42_v4 = vld [vmem:[#allocation5] sm:$0xff]  ;;  %v41_v5 = vld [vmem:[#allocation2] sm:$0xff]  ;;  %vm53_vm1 = vcmask 261120   ;;  %s241_s24 = smov [#allocation7]  }
  0x1c   :  { %152 = vmatpush3.msra.mxu0 %v45_v1  ;;  %v144_v6 = vld [vmem:[%s276_s2] ss:$0 sm:$0xff]  ;;  %s134_s25 = sshll.u32 %s241_s24, 4  ;;  %s135_s25 = int_to_ptr.vmem [resolvable:$true] %s134_s25 }
  0x1d   :  { %153 = vmatprep.subr.mxu0 %v239_v0  ;;  %s209_s26 = scalar_lea.vmem %s135_s25, 128  ;;  %p214_p11 = scmp.lt.s32.totalorder %s135_s25, %s135_s25 }
  0x1e   :  { %154 = vmatpush3.msra.mxu0 %v44_v2  ;;  %p210_p10 = scmp.ne.s32.totalorder %s135_s25, %s209_s26  ;;  %p215_p12 = scmp.lt.s32.totalorder %s209_s26, %s209_s26 }
  0x1f   :  { %155 = vmatprep.subr.mxu0 %v239_v0 }
  0x20   :  { %156 = vmatpush3.msra.mxu0 %v43_v3  ;;  %p216_p13 = por %p215_p12, %p214_p11 }
  0x21   :  { %157 = vmatprep.subr.mxu0 %v239_v0 }
  0x22   :  { %158 = vmatpush3.msra.mxu0 %v42_v4  ;;  %p217_p0 = pnand %p216_p13, %p210_p10 }
  0x23   :  { %160 = vmatmul.mubr.msk.f32.vlgmr.msra.gmra.mxu0 %vm53_vm1, %v41_v5 }
  0xe3   :  { %v123_v7 = vpop.f32.mrf.mxu0 }
  0xe4   :  { %v124_v8 = vadd.f32 %v144_v6, %v123_v7 }
  0xe5   :  { %v161_v9 = vpop.f32.mrf.mxu0 }
  0xe6   :  { %127 = vst [vmem:[#allocation7] sm:$0xff] %v124_v8 }
  0xe7   :  { %220 = shalt.err (!%p217_p0)
}
  0xe8   :  { %137 = dma.vmem_to_hbm [thread:$0]  %s135_s25, 128, %s277_s3, [#allocation4]  }
  0xe9   :  { %233 = dma.done.wait [#allocation4], 128  }
  0xea   :  { %234 = vsyncadd [#allocation4], 4294967168 }
  0xeb   :  { %141 = vsyncpa [#allocation3], 1 }
  0xec   :  { %142 = vsyncpa [#allocation6], 1 }
  0xed   :  { %143 = vsyncpa [#allocation4], 1 }

</bundles_post_ra>
